<compile_context>
chip_gen: v7x
topology: tpu7x:2x2x1
jax: 0.10.0
libtpu: 0.0.40
codegen_flags: <defaults>
</compile_context>

<pallas_src>
import functools

import jax
import jax.numpy as jnp
from jax.experimental import pallas as pl
from jax.experimental.pallas import tpu as pltpu

_MIB = 1024 * 1024


def _round_up(x, m):
    return (x + m - 1) // m * m


def _vmem_budget_bytes():
    """Usable VMEM budget, leaving headroom for Mosaic's internal scratch."""
    try:
        cap = int(pltpu.get_tpu_info().vmem_capacity_bytes)
    except Exception:
        cap = 64 * _MIB            # conservative fallback (v7x physical VMEM)
    return (cap * 3) // 4          # ~48 MiB on v7x, ~96 MiB on v5e/v6e


def _activation_compute_dtype(dtype):
    """v6e/v7x have a bf16 VPU/EUP path; v5e and older do not -> use f32 there."""
    if dtype == jnp.float32:
        return jnp.float32
    try:
        kind = jax.devices()[0].device_kind.lower()
    except Exception:
        kind = ""
    if any(tag in kind for tag in ("v6", "v7", "7x")):
        return dtype
    return jnp.float32


def _choose_tile(dim, align, cap):
    """Pick (tile, padded_dim): tile % align == 0, tile <= cap,
    padded_dim % tile == 0, favouring large tiles with minimal padding."""
    padded = _round_up(max(int(dim), 1), align)
    if padded <= cap:
        return padded, padded
    q = padded // align
    # Largest zero-padding divisor tile.
    best = 0
    d = 1
    while d * d <= q:
        if q % d == 0:
            for f in (d, q // d):
                t = f * align
                if t <= cap and t > best:
                    best = t
        d += 1
    if 2 * best >= cap:
        return best, padded
    # Otherwise split into the fewest near-even tiles (padding < align * nblk).
    nblk = -(-padded // cap)
    tile = _round_up(-(-padded // nblk), align)
    return tile, tile * nblk


def _fc_kernel_plain(x_ref, w_ref, b_ref, o_ref, acc_ref, *, activation, act_dtype):
    """Grid (i, j, k); activation (if any) applied per (tm, tk) x tile."""
    k = pl.program_id(2)

    @pl.when(k == 0)
    def _():
        acc_ref[...] = jnp.zeros_like(acc_ref)

    x = x_ref[...]
    if activation is not None:
        x = activation(x.astype(act_dtype)).astype(x_ref.dtype)

    acc_ref[...] += jnp.dot(x, w_ref[...], preferred_element_type=jnp.float32)

    @pl.when(k == pl.num_programs(2) - 1)
    def _():
        # Bias added exactly once in the epilogue, then cast + lane-dense store.
        o_ref[...] = (acc_ref[...] + b_ref[...]).astype(o_ref.dtype)


def _fc_kernel_cached(x_ref, w_ref, b_ref, o_ref, xact_ref, acc_ref, *,
                      activation, act_dtype):
    """Grid (i, j, k) with j sequential (not core-sharded): the activated x
    tiles for the current i row-panel are written once (at j == 0) into a
    (grid_k, tm, tk) VMEM cache and reused for every other j block."""
    j = pl.program_id(1)
    k = pl.program_id(2)

    @pl.when(k == 0)
    def _():
        acc_ref[...] = jnp.zeros_like(acc_ref)

    @pl.when(j == 0)
    def _():
        xact_ref[k] = activation(x_ref[...].astype(act_dtype)).astype(xact_ref.dtype)

    acc_ref[...] += jnp.dot(xact_ref[k], w_ref[...],
                            preferred_element_type=jnp.float32)

    @pl.when(k == pl.num_programs(2) - 1)
    def _():
        o_ref[...] = (acc_ref[...] + b_ref[...]).astype(o_ref.dtype)


def fc_layer_forward(x, w_t, b, *, use_activation=None, dropout_rate=0.0,
                     tm=None, tn=None, tk=None):
    """Pallas forward for FCLayer.

    x   : [batch, input_dim]
    w_t : [input_dim, output_dim]  (transposed PyTorch Linear weight)
    b   : [output_dim]
    """
    if dropout_rate != 0.0:
        # TODO(synk): training-mode dropout needs pltpu.prng_* masking in-kernel.
        raise NotImplementedError("dropout_rate > 0 (training mode) not implemented")

    batch, input_dim = x.shape
    k_dim, output_dim = w_t.shape
    assert k_dim == input_dim, "weight/input dim mismatch"
    dtype = x.dtype
    dbytes = jnp.dtype(dtype).itemsize
    m_align = 16 if dtype == jnp.bfloat16 else 8
    auto = tm is None and tn is None and tk is None

    # ---- Tile / padded-dim selection: pad only to lane (128) / sublane
    #      multiples where possible; tiles evenly divide the padded dims. ----
    if tm is None:
        tm, M_pad = _choose_tile(batch, m_align, 512)
    else:
        M_pad = _round_up(batch, tm)
    if tn is None:
        tn, N_pad = _choose_tile(output_dim, 128, 512)
    else:
        N_pad = _round_up(output_dim, tn)
    if tk is None:
        tk, K_pad = _choose_tile(input_dim, 128,
                                 2048 if dtype == jnp.bfloat16 else 1024)
    else:
        K_pad = _round_up(input_dim, tk)

    # Keep >= 2 blocks along a core-parallel grid axis when possible so both
    # TensorCores of a v7x chip (megacore) get work.
    if auto and M_pad // tm == 1 and N_pad // tn == 1:
        if use_activation is None and tn % 256 == 0:
            tn //= 2
        elif tm % (2 * m_align) == 0:
            tm //= 2

    grid = (M_pad // tm, N_pad // tn, K_pad // tk)
    grid_j, grid_k = grid[1], grid[2]

    # ---- Zero-pad. Zero K-rows of W_t guarantee padded x columns contribute
    #      nothing even after a non-zero-preserving activation. ----
    x_p = x if (M_pad, K_pad) == (batch, input_dim) else jnp.pad(
        x, ((0, M_pad - batch), (0, K_pad - input_dim)))
    w_p = w_t if (K_pad, N_pad) == (input_dim, output_dim) else jnp.pad(
        w_t, ((0, K_pad - input_dim), (0, N_pad - output_dim)))
    b_p = (b if N_pad == output_dim else jnp.pad(b, (0, N_pad - output_dim))
           ).reshape(1, N_pad)

    act_dtype = _activation_compute_dtype(dtype) if use_activation is not None else None
    vmem_budget = _vmem_budget_bytes()

    # Working-set estimates (2 pipeline buffers per streamed operand).
    cached_ws = (grid_k * tm * tk * dbytes        # activated-x cache (full K panel)
                 + 2 * tm * tk * dbytes           # x double buffer
                 + 2 * tk * tn * dbytes           # W_t double buffer
                 + 2 * tn * dbytes                # bias
                 + 2 * tm * tn * dbytes           # output double buffer
                 + tm * tn * 4)                   # f32 accumulator
    plain_ws = 2 * (tm * tk + tk * tn + tn + tm * tn) * dbytes + tm * tn * 4

    # The activation cache only pays off when the same x panel is swept by >1
    # j block, and only if the cache fits the per-generation VMEM budget.
    use_cache = (use_activation is not None) and grid_j > 1 and cached_ws <= vmem_budget

    if use_cache:
        kernel = functools.partial(_fc_kernel_cached, activation=use_activation,
                                   act_dtype=act_dtype)
        # x is only read at j == 0; freeze its block index at (i, 0) for j > 0
        # so Pallas skips the (unused) x DMAs on the remaining j sweeps.
        x_spec = pl.BlockSpec((tm, tk), lambda i, j, k: (i, jnp.where(j == 0, k, 0)))
        scratch = [pltpu.VMEM((grid_k, tm, tk), dtype),   # activated x cache
                   pltpu.VMEM((tm, tn), jnp.float32)]     # f32 accumulator
        # j must stay on one core: the cache is filled at j == 0.
        dim_sem = ("parallel", "arbitrary", "arbitrary")
        working_set = cached_ws
    else:
        kernel = functools.partial(_fc_kernel_plain, activation=use_activation,
                                   act_dtype=act_dtype)
        x_spec = pl.BlockSpec((tm, tk), lambda i, j, k: (i, k))
        scratch = [pltpu.VMEM((tm, tn), jnp.float32)]
        dim_sem = ("parallel", "parallel", "arbitrary")
        working_set = plain_ws

    vmem_limit = int(min(max(working_set * 3 // 2, 16 * _MIB), vmem_budget))

    out = pl.pallas_call(
        kernel,
        out_shape=jax.ShapeDtypeStruct((M_pad, N_pad), dtype),
        grid_spec=pltpu.PrefetchScalarGridSpec(
            num_scalar_prefetch=0,
            grid=grid,
            in_specs=[
                x_spec,                                           # x tile
                pl.BlockSpec((tk, tn), lambda i, j, k: (k, j)),   # W_t tile (streamed)
                pl.BlockSpec((1, tn), lambda i, j, k: (0, j)),    # bias (epilogue only)
            ],
            out_specs=pl.BlockSpec((tm, tn), lambda i, j, k: (i, j)),
            scratch_shapes=scratch,
        ),
        compiler_params=pltpu.CompilerParams(
            dimension_semantics=dim_sem,
            vmem_limit_bytes=vmem_limit,
        ),
    )(x_p, w_p, b_p)

    return out[:batch, :output_dim]


def init_fc_params(key, input_dim, output_dim, dtype=jnp.float32):
    """Deterministic init mirroring torch.nn.Linear (uniform(-1/sqrt(in), 1/sqrt(in)))."""
    kw, kb = jax.random.split(key)
    bound = 1.0 / float(input_dim) ** 0.5
    w = jax.random.uniform(kw, (output_dim, input_dim), dtype, -bound, bound)
    b = jax.random.uniform(kb, (output_dim,), dtype, -bound, bound)
    return w, b


def fc_layer_reference(x, w, b, use_activation=None):
    """Pure-JAX reference of the PyTorch forward (dropout rate 0.0 -> identity)."""
    if use_activation is not None:
        x = use_activation(x)
    return x @ w.T + b


if __name__ == "__main__":
    key = jax.random.PRNGKey(0)
    use_activation = jnp.tanh  # matches FCLayer(use_activation=torch.tanh)

    # --- Test 1: small demo shapes (single-tile grid, plain kernel path) ---
    batch, input_dim, output_dim = 8, 32, 32
    kx, kp, key = jax.random.split(key, 3)
    x = jax.random.normal(kx, (batch, input_dim), jnp.float32)
    w, b = init_fc_params(kp, input_dim, output_dim)

    out = jax.block_until_ready(fc_layer_forward(x, w.T, b, use_activation=use_activation))
    ref = fc_layer_reference(x, w, b, use_activation=use_activation)
    assert out.shape == (batch, output_dim)
    assert jnp.allclose(out, ref, atol=1e-5, rtol=1e-5), "mismatch vs reference (small)"

    # --- Test 2: forced tiles -> multi-tile (2, 2, 3) grid, exercising the
    #     activation cache, accumulator init / bias epilogue, and padding. ---
    batch2, in2, out2 = 16, 320, 192
    kx2, kp2, key = jax.random.split(key, 3)
    x2 = jax.random.normal(kx2, (batch2, in2), jnp.float32)
    w2, b2 = init_fc_params(kp2, in2, out2)

    out_t = jax.block_until_ready(
        fc_layer_forward(x2, w2.T, b2, use_activation=use_activation,
                         tm=8, tn=128, tk=128))  # grid = (2, 2, 3), cached path
    ref_t = fc_layer_reference(x2, w2, b2, use_activation=use_activation)
    assert out_t.shape == (batch2, out2)
    assert jnp.allclose(out_t, ref_t, atol=1e-4, rtol=1e-4), "mismatch vs reference (tiled)"

    # --- Test 3: bf16, auto tiles, lane-padded N, cached path with bf16 (or f32
    #     on v5e) activation compute dtype. ---
    batch3, in3, out3 = 32, 384, 640
    kx3, kp3 = jax.random.split(key)
    x3 = jax.random.normal(kx3, (batch3, in3), jnp.bfloat16)
    w3, b3 = init_fc_params(kp3, in3, out3, dtype=jnp.bfloat16)

    out_b = jax.block_until_ready(
        fc_layer_forward(x3, w3.T, b3, use_activation=use_activation))
    ref_b = fc_layer_reference(x3.astype(jnp.float32), w3.astype(jnp.float32),
                               b3.astype(jnp.float32), use_activation=use_activation)
    assert out_b.shape == (batch3, out3)
    assert jnp.allclose(out_b.astype(jnp.float32), ref_b, atol=5e-2, rtol=5e-2), \
        "mismatch vs reference (bf16)"

    print("KERNEL_OK")
</pallas_src>

<mosaic_0001>
module attributes {stable_mosaic.version = 11 : i64} {
  func.func @_fc_kernel_plain(%arg0: i32, %arg1: i32, %arg2: i32, %arg3: memref<8x128xf32, #tpu.memory_space<vmem>>, %arg4: memref<128x128xf32, #tpu.memory_space<vmem>>, %arg5: memref<1x128xf32, #tpu.memory_space<vmem>>, %arg6: memref<8x128xf32, #tpu.memory_space<vmem>>, %arg7: memref<8x128xf32, #tpu.memory_space<vmem>>) attributes {dimension_semantics = [#tpu.dimension_semantics<parallel>, #tpu.dimension_semantics<parallel>, #tpu.dimension_semantics<arbitrary>], iteration_bounds = array<i64: 1, 1, 1>, scalar_prefetch = 0 : i64, scratch_operands = 1 : i64, tpu.core_type = #tpu.core_type<tc>, window_params = [{transform_indices = @transform_0, window_bounds = array<i64: 8, 128>}, {transform_indices = @transform_1, window_bounds = array<i64: 128, 128>}, {transform_indices = @transform_2, window_bounds = array<i64: 1, 128>}, {transform_indices = @transform_3, window_bounds = array<i64: 8, 128>}]} {
    %c0_i32 = arith.constant 0 : i32
    %0 = arith.cmpi eq, %arg2, %c0_i32 : i32
    %1 = arith.extui %0 : i1 to i32
    %c0_i32_0 = arith.constant 0 : i32
    %2 = arith.cmpi ne, %1, %c0_i32_0 : i32
    scf.if %2 {
      %cst_10 = arith.constant 0.000000e+00 : f32
      %13 = vector.broadcast %cst_10 : f32 to vector<8x128xf32>
      %c0_11 = arith.constant 0 : index
      %c0_12 = arith.constant 0 : index
      %14 = vector.load %arg7[%c0_11, %c0_12] : memref<8x128xf32, #tpu.memory_space<vmem>>, vector<8x128xf32>
      tpu.vector_store %arg7[%c0_11, %c0_12], %13 {strides = array<i32>} : memref<8x128xf32, #tpu.memory_space<vmem>>, vector<8x128xf32>,
    } else {
    }
    %c0 = arith.constant 0 : index
    %c0_1 = arith.constant 0 : index
    %3 = vector.load %arg3[%c0, %c0_1] : memref<8x128xf32, #tpu.memory_space<vmem>>, vector<8x128xf32>
    %4 = math.tanh %3 : vector<8x128xf32>
    %c0_2 = arith.constant 0 : index
    %c0_3 = arith.constant 0 : index
    %5 = vector.load %arg7[%c0_2, %c0_3] : memref<8x128xf32, #tpu.memory_space<vmem>>, vector<8x128xf32>
    %c0_4 = arith.constant 0 : index
    %c0_5 = arith.constant 0 : index
    %6 = vector.load %arg4[%c0_4, %c0_5] : memref<128x128xf32, #tpu.memory_space<vmem>>, vector<128x128xf32>
    %cst = arith.constant dense<0.000000e+00> : vector<8x128xf32>
    %7 = tpu.matmul %4, %6, %cst {dimension_numbers = #tpu.dot_dimension_numbers<[1], [0], [0], [1], [0, 0, 1, 1], [], []>} : vector<8x128xf32>, vector<128x128xf32>, vector<8x128xf32> -> vector<8x128xf32>
    %8 = arith.addf %5, %7 : vector<8x128xf32>
    %c0_6 = arith.constant 0 : index
    %c0_7 = arith.constant 0 : index
    %9 = vector.load %arg7[%c0_6, %c0_7] : memref<8x128xf32, #tpu.memory_space<vmem>>, vector<8x128xf32>
    tpu.vector_store %arg7[%c0_6, %c0_7], %8 {strides = array<i32>} : memref<8x128xf32, #tpu.memory_space<vmem>>, vector<8x128xf32>,
    %c0_i32_8 = arith.constant 0 : i32
    %10 = arith.cmpi eq, %arg2, %c0_i32_8 : i32
    %11 = arith.extui %10 : i1 to i32
    %c0_i32_9 = arith.constant 0 : i32
    %12 = arith.cmpi ne, %11, %c0_i32_9 : i32
    scf.if %12 {
      %c0_10 = arith.constant 0 : index
      %c0_11 = arith.constant 0 : index
      %13 = vector.load %arg7[%c0_10, %c0_11] : memref<8x128xf32, #tpu.memory_space<vmem>>, vector<8x128xf32>
      %c0_12 = arith.constant 0 : index
      %c0_13 = arith.constant 0 : index
      %14 = vector.load %arg5[%c0_12, %c0_13] : memref<1x128xf32, #tpu.memory_space<vmem>>, vector<1x128xf32>
      %15 = vector.broadcast %14 : vector<1x128xf32> to vector<8x128xf32>
      %16 = arith.addf %13, %15 : vector<8x128xf32>
      %c0_14 = arith.constant 0 : index
      %c0_15 = arith.constant 0 : index
      %17 = vector.load %arg6[%c0_14, %c0_15] : memref<8x128xf32, #tpu.memory_space<vmem>>, vector<8x128xf32>
      tpu.vector_store %arg6[%c0_14, %c0_15], %16 {strides = array<i32>} : memref<8x128xf32, #tpu.memory_space<vmem>>, vector<8x128xf32>,
    } else {
    }
    return
  }
  func.func @transform_0(%arg0: i32, %arg1: i32, %arg2: i32) -> (i32, i32) {
    %c0_i32 = arith.constant 0 : i32
    return %arg0, %arg2 : i32, i32
  }
  func.func @transform_1(%arg0: i32, %arg1: i32, %arg2: i32) -> (i32, i32) {
    %c0_i32 = arith.constant 0 : i32
    return %arg2, %arg1 : i32, i32
  }
  func.func @transform_2(%arg0: i32, %arg1: i32, %arg2: i32) -> (i32, i32) {
    %c0_i32 = arith.constant 0 : i32
    %c0_i32_0 = arith.constant 0 : i32
    return %c0_i32, %arg1 : i32, i32
  }
  func.func @transform_3(%arg0: i32, %arg1: i32, %arg2: i32) -> (i32, i32) {
    %c0_i32 = arith.constant 0 : i32
    return %arg0, %arg1 : i32, i32
  }
}

</mosaic_0001>

<bundles_post_ra>
// kernel: tpu_custom_call.1
= control target key start
LH: loop header
LB: loop body
LE: loop exit
PB: predicated region body
PF: predicated region fallthrough
CT: control target
= control target key end

     0   :  { %8 = vsyncpa [#allocation4], 0  ;;  %s399_s0 = inlined_call_operand.hbm [shape: f32[8,128], index: 0, kind: input, shape index: {}]   ;;  %s400_s1 = inlined_call_operand.hbm [shape: f32[128,128], index: 1, kind: input, shape index: {}]   ;;  %s401_s2 = inlined_call_operand.vmem [shape: f32[1,128], index: 2, kind: input, shape index: {}]   ;;  %s402_s3 = inlined_call_operand.hbm [shape: f32[8,128], index: 3, kind: output, shape index: {}]  }
   0x1   :  { %9 = vsyncpa [#allocation7], 0 }
   0x2   :  { %10 = vsyncpa [#allocation5], 0  ;;  %s325_s12 = smov [#allocation3]   ;;  %s326_s14 = smov [#allocation6]  }
   0x3   :  { %s17_s13 = sshll.u32 %s325_s12, 4  ;;  %s26_s15 = sshll.u32 %s326_s14, 4  ;;  %s18_s13 = int_to_ptr.vmem [resolvable:$true] %s17_s13  ;;  %s353_s15 = int_to_ptr.vmem [resolvable:$true] %s26_s15 }
   0x4   :  { %s253_s18 = scalar_lea.hbm %s399_s0, 128 }
   0x5   :  { %p254_p0 = scmp.ne.s32.totalorder %s399_s0, %s253_s18  ;;  %p257_p1 = scmp.lt.u32.totalorder %s253_s18, %s399_s0 }
   0x7   :  { %p259_p2 = pnand %p257_p1, %p254_p0 }
   0x9   :  { %262 = shalt.err (!%p259_p2)
}
   0xa   :  { %s263_s23 = scalar_lea.vmem %s18_s13, 128  ;;  %p268_p4 = scmp.lt.s32.totalorder %s18_s13, %s18_s13 }
   0xb   :  { %p264_p3 = scmp.ne.s32.totalorder %s18_s13, %s263_s23  ;;  %p269_p5 = scmp.lt.s32.totalorder %s263_s23, %s263_s23 }
   0xd   :  { %p270_p6 = por %p269_p5, %p268_p4 }
   0xf   :  { %p271_p7 = pnand %p270_p6, %p264_p3 }
  0x11   :  { %274 = shalt.err (!%p271_p7)
}
  0x12   :  { %20 = dma.hbm_to_vmem [thread:$0]  %s399_s0, 128, %s18_s13, [#allocation4]  }
  0x13   :  { %s275_s28 = scalar_lea.hbm %s400_s1, 2048 }
  0x14   :  { %p276_p8 = scmp.ne.s32.totalorder %s400_s1, %s275_s28  ;;  %p279_p9 = scmp.lt.u32.totalorder %s275_s28, %s400_s1 }
  0x16   :  { %p281_p10 = pnand %p279_p9, %p276_p8 }
  0x18   :  { %284 = shalt.err (!%p281_p10)
}
  0x19   :  { %s285_s6 = scalar_lea.vmem %s353_s15, 2048  ;;  %p290_p12 = scmp.lt.s32.totalorder %s353_s15, %s353_s15 }
  0x1a   :  { %p286_p11 = scmp.ne.s32.totalorder %s353_s15, %s285_s6  ;;  %p291_p13 = scmp.lt.s32.totalorder %s285_s6, %s285_s6 }
  0x1c   :  { %p292_p0 = por %p291_p13, %p290_p12 }
  0x1e   :  { %p293_p1 = pnand %p292_p0, %p286_p11 }
  0x20   :  { %296 = shalt.err (!%p293_p1)
}
  0x21   :  { %s327_s0 = smov 128   ;;  %s328_s7 = smov 8  }
  0x22   :  { %32 = dma.hbm_to_vmem [thread:$0]  %s400_s1, 2048, %s353_s15, [#allocation7], %s327_s0, %s327_s0, %s328_s7  }
  0x23   :  { %319 = dma.done.wait [#allocation4], 128  }
  0x24   :  { %320 = vsyncadd [#allocation4], 4294967168 }
  0x25   :  { %321 = dma.done.wait [#allocation7], 2048  }
  0x26   :  { %322 = vsyncadd [#allocation7], 4294965248  ;;  %v329_v0 = vmov 0.0|0.0   ;;  %vm330_vm0 = vmmov 0   ;;  %v331_v1 = vmov 0.0   ;;  %v49_v2 = vld [vmem:[#allocation6] sm:$0xff] }
  0x27   :  { %219 = vmatprep.subr.bf16.mxu0 %v329_v0  ;;  %216 = vmatprep.mubr.msk.f32.mxu0 %vm330_vm0, %v331_v1  ;;  %v50_v3 = vld [vmem:[#allocation6 + $0x8] sm:$0xff]  ;;  %v51_v4 = vld [vmem:[#allocation6 + $0x10] sm:$0xff]  ;;  %v52_v6 = vld [vmem:[#allocation6 + $0x18] sm:$0xff]  ;;  %s332_s11 = smov [#allocation8]  }
  0x28   :  { %v220_v5 = vpack.c.bf16 %v50_v3, %v49_v2  ;;  %v223_v7 = vpack.c.bf16 %v52_v6, %v51_v4  ;;  %v53_v8 = vld [vmem:[#allocation6 + $0x20] sm:$0xff]  ;;  %v54_v9 = vld [vmem:[#allocation6 + $0x28] sm:$0xff]  ;;  %v55_v11 = vld [vmem:[#allocation6 + $0x30] sm:$0xff]  ;;  %s156_s12 = sshll.u32 %s332_s11, 4  ;;  %s157_s12 = int_to_ptr.vmem [resolvable:$true] %s156_s12 }
  0x29   :  { %v226_v10 = vpack.c.bf16 %v54_v9, %v53_v8  ;;  %v56_v12 = vld [vmem:[#allocation6 + $0x38] sm:$0xff]  ;;  %v57_v14 = vld [vmem:[#allocation6 + $0x40] sm:$0xff]  ;;  %v58_v15 = vld [vmem:[#allocation6 + $0x48] sm:$0xff]  ;;  %s297_s13 = scalar_lea.vmem %s157_s12, 128  ;;  %p302_p3 = scmp.lt.s32.totalorder %s157_s12, %s157_s12 }
  0x2a   :  { %221 = vmatpush3.bf16.msra.mxu0 %v220_v5  ;;  %v229_v13 = vpack.c.bf16 %v56_v12, %v55_v11  ;;  %v232_v16 = vpack.c.bf16 %v58_v15, %v57_v14  ;;  %v59_v17 = vld [vmem:[#allocation6 + $0x50] sm:$0xff]  ;;  %v60_v18 = vld [vmem:[#allocation6 + $0x58] sm:$0xff]  ;;  %v61_v21 = vld [vmem:[#allocation6 + $0x60] sm:$0xff]  ;;  %p298_p2 = scmp.ne.s32.totalorder %s157_s12, %s297_s13  ;;  %p303_p4 = scmp.lt.s32.totalorder %s297_s13, %s297_s13 }
  0x2b   :  { %222 = vmatprep.subr.bf16.mxu0 %v329_v0  ;;  %v46_v19 = vld [vmem:[#allocation3] sm:$0xff]  ;;  %v235_v20 = vpack.c.bf16 %v60_v18, %v59_v17  ;;  %v62_v22 = vld [vmem:[#allocation6 + $0x68] sm:$0xff]  ;;  %v63_v24 = vld [vmem:[#allocation6 + $0x70] sm:$0xff] }
  0x2c   :  { %251 = vtanh.f32 %v46_v19  ;;  %v238_v23 = vpack.c.bf16 %v62_v22, %v61_v21  ;;  %v64_v25 = vld [vmem:[#allocation6 + $0x78] sm:$0xff]  ;;  %p304_p5 = por %p303_p4, %p302_p3 }
  0x2d   :  { %v241_v26 = vpack.c.bf16 %v64_v25, %v63_v24  ;;  %v166_v28 = vld [vmem:[%s401_s2] ss:$0 sm:$0xff] }
  0x2e   :  { %224 = vmatpush3.bf16.msra.mxu0 %v223_v7  ;;  %p305_p6 = pnand %p304_p5, %p298_p2 }
  0x2f   :  { %225 = vmatprep.subr.bf16.mxu0 %v329_v0 }
  0x32   :  { %227 = vmatpush3.bf16.msra.mxu0 %v226_v10 }
  0x33   :  { %228 = vmatprep.subr.bf16.mxu0 %v329_v0 }
  0x36   :  { %230 = vmatpush3.bf16.msra.mxu0 %v229_v13  ;;  %v252_v27 = vpop.eup %251 }
  0x37   :  { %231 = vmatprep.subr.bf16.mxu0 %v329_v0 }
  0x3a   :  { %233 = vmatpush3.bf16.msra.mxu0 %v232_v16 }
  0x3b   :  { %234 = vmatprep.subr.bf16.mxu0 %v329_v0 }
  0x3e   :  { %236 = vmatpush3.bf16.msra.mxu0 %v235_v20 }
  0x3f   :  { %237 = vmatprep.subr.bf16.mxu0 %v329_v0 }
  0x42   :  { %239 = vmatpush3.bf16.msra.mxu0 %v238_v23 }
  0x43   :  { %240 = vmatprep.subr.bf16.mxu0 %v329_v0 }
  0x46   :  { %242 = vmatpush3.bf16.msra.mxu0 %v241_v26 }
  0x49   :  { %217 = vmatmul.mubr.f32.vlgmr.msra.gmra.mrb[0].mxu0 %v252_v27 }
 0x11c   :  { %v131_v29 = vpop.f32.mrb[0].mxu0 }
 0x11d   :  { %v148_v30 = vadd.f32 %v166_v28, %v131_v29  ;;  %v218_v31 = vpop.f32.mrb[1].mxu0 }
 0x11f   :  { %149 = vst [vmem:[#allocation8] sm:$0xff] %v148_v30 }
 0x120   :  { %308 = shalt.err (!%p305_p6)
}
 0x121   :  { %s309_s16 = scalar_lea.hbm %s402_s3, 128 }
 0x122   :  { %p310_p7 = scmp.ne.s32.totalorder %s402_s3, %s309_s16  ;;  %p313_p8 = scmp.lt.u32.totalorder %s309_s16, %s402_s3 }
 0x124   :  { %p315_p9 = pnand %p313_p8, %p310_p7 }
 0x126   :  { %318 = shalt.err (!%p315_p9)
}
 0x127   :  { %159 = dma.vmem_to_hbm [thread:$0]  %s157_s12, 128, %s402_s3, [#allocation5]  }
 0x128   :  { %323 = dma.done.wait [#allocation5], 128  }
 0x129   :  { %324 = vsyncadd [#allocation5], 4294967168 }
 0x12a   :  { %163 = vsyncpa [#allocation4], 1 }
 0x12b   :  { %164 = vsyncpa [#allocation7], 1 }
 0x12c   :  { %165 = vsyncpa [#allocation5], 1 }

</bundles_post_ra>
